<compile_context>
chip_gen: v5e
topology: v5e:2x2
jax: 0.10.0
libtpu: 0.0.40
codegen_flags: <defaults>
</compile_context>

<pallas_src>
import jax
import jax.numpy as jnp
from jax.experimental import pallas as pl
from jax.experimental.pallas import tpu as pltpu

BETA = 0.9
THRESHOLD = 1.0
SLOPE = 10.0


def _round_up(x, m):
    return ((x + m - 1) // m) * m


def _sigmoid(z):
    # exp + approx reciprocal both issue on the EUP slot (idle relative to the VPU here).
    return pl.reciprocal(1.0 + jnp.exp(-z), approx=True)


def fraud_snn_kernel(x_ref, w1_ref, b1_ref, w2_ref, b2_ref, out_ref):
    """One batch tile of the unrolled 2-step SNN forward.

    x_ref  : (TILE_B, 2F) f32   -- [x_t0 | x_t1] per row
    w1_ref : (2F, 2H)     f32   -- block-diag([w1, w1]) so both timesteps' fc1 fuse
    b1_ref : (1, 2H)      f32   -- [b1 | b1]
    w2_ref : (1, H)       f32   -- fc2 weight row
    b2_ref : (1, 1)       f32
    out_ref: (TILE_B, 1)  f32
    """
    H = w2_ref.shape[1]

    # Fused fc1 for both timesteps: one MXU pass -> (TILE_B, 2H) = [cur1_t0 | cur1_t1].
    cur1 = (
        jnp.dot(x_ref[...], w1_ref[...], preferred_element_type=jnp.float32)
        + b1_ref[...]
    )
    cur1_0 = cur1[:, :H]
    cur1_1 = cur1[:, H:]

    w2_row = w2_ref[...]   # (1, H), broadcast over the batch tile
    b2 = b2_ref[...]       # (1, 1)

    # ---- time step 0 (mem1 = mem2 = 0 initially) ----
    mem1 = cur1_0                                        # beta * 0 + cur1
    spk1 = _sigmoid(SLOPE * (mem1 - THRESHOLD))
    mem1 = mem1 - spk1 * THRESHOLD

    # fc2 as VPU multiply + lane reduction (N=1 matmul would waste the MXU).
    cur2 = jnp.sum(spk1 * w2_row, axis=-1, keepdims=True) + b2
    mem2 = cur2                                          # beta * 0 + cur2
    spk2_0 = _sigmoid(SLOPE * (mem2 - THRESHOLD))
    mem2 = mem2 - spk2_0 * THRESHOLD

    # ---- time step 1 ----
    mem1 = BETA * mem1 + cur1_1
    spk1 = _sigmoid(SLOPE * (mem1 - THRESHOLD))
    # (mem1 / mem2 resets after the last step never feed the output -> dropped)

    cur2 = jnp.sum(spk1 * w2_row, axis=-1, keepdims=True) + b2
    mem2 = BETA * mem2 + cur2
    spk2_1 = _sigmoid(SLOPE * (mem2 - THRESHOLD))

    # ---- readout: sigmoid(mean of the two output spikes) ----
    out_ref[...] = _sigmoid(0.5 * (spk2_0 + spk2_1))


def fraud_snn_forward(x, w1, b1, w2, b2, *, tile_b=512):
    """x: (B, 2, F) f32.  w1: (F, H) (transposed vs. PyTorch), b1: (H,), w2: (H, 1), b2: (1,).

    Returns (B, 1) f32.
    """
    B, T, F = x.shape
    assert T == 2, "unrolled version requires time_steps == 2"
    H = w1.shape[1]

    # Contiguous (B, 2F) slab -- free reshape, single input DMA stream per tile.
    x2 = x.astype(jnp.float32).reshape(B, 2 * F)

    # Block-diagonal fc1 weight so both timesteps share one MXU pass.
    w_big = jnp.zeros((2 * F, 2 * H), jnp.float32)
    w_big = w_big.at[:F, :H].set(w1.astype(jnp.float32))
    w_big = w_big.at[F:, H:].set(w1.astype(jnp.float32))
    b_big = jnp.concatenate([b1, b1]).astype(jnp.float32).reshape(1, 2 * H)

    w2_row = w2.astype(jnp.float32).reshape(1, H)
    b2_2d = b2.astype(jnp.float32).reshape(1, 1)

    # Batch tiling: sublane-aligned tile, pad B up to a multiple of tile_b.
    tile_b = min(tile_b, _round_up(B, 8))
    Bp = _round_up(B, tile_b)
    if Bp != B:
        x2 = jnp.pad(x2, ((0, Bp - B), (0, 0)))
    num_tiles = Bp // tile_b

    cost = pl.CostEstimate(
        flops=Bp * (2 * (2 * F) * (2 * H) + 4 * H),
        transcendentals=Bp * (2 * H + 3) * 2,            # exp + approx reciprocal per sigmoid
        bytes_accessed=(x2.size + Bp + w_big.size + b_big.size + w2_row.size + 1) * 4,
    )

    out = pl.pallas_call(
        fraud_snn_kernel,
        out_shape=jax.ShapeDtypeStruct((Bp, 1), jnp.float32),
        grid_spec=pltpu.PrefetchScalarGridSpec(
            num_scalar_prefetch=0,
            grid=(num_tiles,),
            in_specs=[
                pl.BlockSpec((tile_b, 2 * F), lambda i: (i, 0)),     # x tile (pipelined)
                pl.BlockSpec((2 * F, 2 * H), lambda i: (0, 0)),      # Wbig  (VMEM-resident)
                pl.BlockSpec((1, 2 * H), lambda i: (0, 0)),          # b_big (VMEM-resident)
                pl.BlockSpec((1, H), lambda i: (0, 0)),              # w2    (VMEM-resident)
                pl.BlockSpec((1, 1), lambda i: (0, 0)),              # b2    (VMEM-resident)
            ],
            out_specs=pl.BlockSpec((tile_b, 1), lambda i: (i, 0)),
        ),
        compiler_params=pltpu.CompilerParams(
            dimension_semantics=("parallel",),
            vmem_limit_bytes=32 * 1024 * 1024,
        ),
        cost_estimate=cost,
    )(x2, w_big, b_big, w2_row, b2_2d)

    return out[:B]


def _ref_forward(x, w1, b1, w2, b2):
    """Pure-JAX reference matching the PyTorch FraudSNN forward (soft surrogate spikes)."""
    def lif(cur, mem):
        mem = BETA * mem + cur
        spk = jax.nn.sigmoid(SLOPE * (mem - THRESHOLD))
        mem = mem - spk * THRESHOLD
        return spk, mem

    B = x.shape[0]
    H = w1.shape[1]
    mem1 = jnp.zeros((B, H), jnp.float32)
    mem2 = jnp.zeros((B, 1), jnp.float32)

    cur1 = x[:, 0, :] @ w1 + b1
    spk1, mem1 = lif(cur1, mem1)
    cur2 = spk1 @ w2 + b2
    spk2_0, mem2 = lif(cur2, mem2)

    cur1 = x[:, 1, :] @ w1 + b1
    spk1, mem1 = lif(cur1, mem1)
    cur2 = spk1 @ w2 + b2
    spk2_1, mem2 = lif(cur2, mem2)

    return jax.nn.sigmoid((spk2_0 + spk2_1) / 2.0)


if __name__ == "__main__":
    # Small shapes consistent with the module: batch=4, time_steps=2, input_size=16, hidden=32.
    B, T, F, H = 4, 2, 16, 32

    key = jax.random.PRNGKey(0)
    kx, kw1, kb1, kw2, kb2 = jax.random.split(key, 5)

    x = jax.random.normal(kx, (B, T, F), dtype=jnp.float32)

    # Deterministic parameter init mimicking nn.Linear's U(-1/sqrt(fan_in), 1/sqrt(fan_in)).
    lim1 = 1.0 / jnp.sqrt(jnp.float32(F))
    lim2 = 1.0 / jnp.sqrt(jnp.float32(H))
    w1 = jax.random.uniform(kw1, (F, H), jnp.float32, -lim1, lim1)   # fc1 weight (transposed)
    b1 = jax.random.uniform(kb1, (H,), jnp.float32, -lim1, lim1)     # fc1 bias
    w2 = jax.random.uniform(kw2, (H, 1), jnp.float32, -lim2, lim2)   # fc2 weight (transposed)
    b2 = jax.random.uniform(kb2, (1,), jnp.float32, -lim2, lim2)     # fc2 bias

    out = fraud_snn_forward(x, w1, b1, w2, b2)
    out = jax.block_until_ready(out)

    ref = _ref_forward(x, w1, b1, w2, b2)
    assert out.shape == (B, 1)
    # Tolerance covers the EUP approximate-reciprocal used inside the in-kernel sigmoids.
    assert jnp.allclose(out, ref, atol=1e-2, rtol=1e-2), (out, ref)

    print("KERNEL_OK")
</pallas_src>

<mosaic_0001>
module attributes {stable_mosaic.version = 11 : i64} {
  func.func @fraud_snn_kernel(%arg0: i32, %arg1: memref<8x32xf32, #tpu.memory_space<vmem>>, %arg2: memref<32x64xf32, #tpu.memory_space<vmem>>, %arg3: memref<1x64xf32, #tpu.memory_space<vmem>>, %arg4: memref<1x32xf32, #tpu.memory_space<vmem>>, %arg5: memref<1x1xf32, #tpu.memory_space<vmem>>, %arg6: memref<8x1xf32, #tpu.memory_space<vmem>>) attributes {dimension_semantics = [#tpu.dimension_semantics<parallel>], iteration_bounds = array<i64: 1>, scalar_prefetch = 0 : i64, scratch_operands = 0 : i64, tpu.core_type = #tpu.core_type<tc>, window_params = [{transform_indices = @transform_0, window_bounds = array<i64: 8, 32>}, {pipeline_mode = #tpu.pipeline_mode<synchronous>, transform_indices = @transform_1, window_bounds = array<i64: 32, 64>}, {pipeline_mode = #tpu.pipeline_mode<synchronous>, transform_indices = @transform_2, window_bounds = array<i64: 1, 64>}, {pipeline_mode = #tpu.pipeline_mode<synchronous>, transform_indices = @transform_3, window_bounds = array<i64: 1, 32>}, {pipeline_mode = #tpu.pipeline_mode<synchronous>, transform_indices = @transform_4, window_bounds = array<i64: 1, 1>}, {transform_indices = @transform_5, window_bounds = array<i64: 8, 1>}]} {
    %c0 = arith.constant 0 : index
    %c0_0 = arith.constant 0 : index
    %0 = vector.load %arg1[%c0, %c0_0] : memref<8x32xf32, #tpu.memory_space<vmem>>, vector<8x32xf32>
    %c0_1 = arith.constant 0 : index
    %c0_2 = arith.constant 0 : index
    %1 = vector.load %arg2[%c0_1, %c0_2] : memref<32x64xf32, #tpu.memory_space<vmem>>, vector<32x64xf32>
    %cst = arith.constant dense<0.000000e+00> : vector<8x64xf32>
    %2 = tpu.matmul %0, %1, %cst {dimension_numbers = #tpu.dot_dimension_numbers<[1], [0], [0], [1], [0, 0, 1, 1], [], []>} : vector<8x32xf32>, vector<32x64xf32>, vector<8x64xf32> -> vector<8x64xf32>
    %c0_3 = arith.constant 0 : index
    %c0_4 = arith.constant 0 : index
    %3 = vector.load %arg3[%c0_3, %c0_4] : memref<1x64xf32, #tpu.memory_space<vmem>>, vector<1x64xf32>
    %4 = vector.broadcast %3 : vector<1x64xf32> to vector<8x64xf32>
    %5 = arith.addf %2, %4 : vector<8x64xf32>
    %6 = vector.extract_strided_slice %5 {offsets = [0, 0], sizes = [8, 32], strides = [1, 1]} : vector<8x64xf32> to vector<8x32xf32>
    %7 = vector.extract_strided_slice %5 {offsets = [0, 32], sizes = [8, 32], strides = [1, 1]} : vector<8x64xf32> to vector<8x32xf32>
    %c0_5 = arith.constant 0 : index
    %c0_6 = arith.constant 0 : index
    %8 = vector.load %arg4[%c0_5, %c0_6] : memref<1x32xf32, #tpu.memory_space<vmem>>, vector<1x32xf32>
    %c0_7 = arith.constant 0 : index
    %c0_8 = arith.constant 0 : index
    %9 = vector.load %arg5[%c0_7, %c0_8] : memref<1x1xf32, #tpu.memory_space<vmem>>, vector<1x1xf32>
    %cst_9 = arith.constant 1.000000e+00 : f32
    %10 = vector.broadcast %cst_9 : f32 to vector<8x32xf32>
    %11 = arith.subf %6, %10 : vector<8x32xf32>
    %cst_10 = arith.constant 1.000000e+01 : f32
    %12 = vector.broadcast %cst_10 : f32 to vector<8x32xf32>
    %13 = arith.mulf %12, %11 : vector<8x32xf32>
    %cst_11 = arith.constant 0.000000e+00 : f32
    %14 = vector.broadcast %cst_11 : f32 to vector<8x32xf32>
    %15 = arith.subf %14, %13 : vector<8x32xf32>
    %16 = math.exp %15 : vector<8x32xf32>
    %cst_12 = arith.constant 1.000000e+00 : f32
    %17 = vector.broadcast %cst_12 : f32 to vector<8x32xf32>
    %18 = arith.addf %17, %16 : vector<8x32xf32>
    %19 = tpu.reciprocal %18 {approx = true} : vector<8x32xf32> -> vector<8x32xf32>
    %cst_13 = arith.constant 1.000000e+00 : f32
    %20 = vector.broadcast %cst_13 : f32 to vector<8x32xf32>
    %21 = arith.mulf %19, %20 : vector<8x32xf32>
    %22 = arith.subf %6, %21 : vector<8x32xf32>
    %23 = vector.broadcast %8 : vector<1x32xf32> to vector<8x32xf32>
    %24 = arith.mulf %19, %23 : vector<8x32xf32>
    %cst_14 = arith.constant dense<0.000000e+00> : vector<8xf32>
    %25 = vector.multi_reduction <add>, %24, %cst_14 [1] : vector<8x32xf32> to vector<8xf32>
    %26 = vector.shape_cast %25 : vector<8xf32> to vector<8x1xf32>
    %27 = vector.broadcast %9 : vector<1x1xf32> to vector<8x1xf32>
    %28 = arith.addf %26, %27 : vector<8x1xf32>
    %cst_15 = arith.constant 1.000000e+00 : f32
    %29 = vector.broadcast %cst_15 : f32 to vector<8x1xf32>
    %30 = arith.subf %28, %29 : vector<8x1xf32>
    %cst_16 = arith.constant 1.000000e+01 : f32
    %31 = vector.broadcast %cst_16 : f32 to vector<8x1xf32>
    %32 = arith.mulf %31, %30 : vector<8x1xf32>
    %cst_17 = arith.constant 0.000000e+00 : f32
    %33 = vector.broadcast %cst_17 : f32 to vector<8x1xf32>
    %34 = arith.subf %33, %32 : vector<8x1xf32>
    %35 = math.exp %34 : vector<8x1xf32>
    %cst_18 = arith.constant 1.000000e+00 : f32
    %36 = vector.broadcast %cst_18 : f32 to vector<8x1xf32>
    %37 = arith.addf %36, %35 : vector<8x1xf32>
    %38 = tpu.reciprocal %37 {approx = true} : vector<8x1xf32> -> vector<8x1xf32>
    %cst_19 = arith.constant 1.000000e+00 : f32
    %39 = vector.broadcast %cst_19 : f32 to vector<8x1xf32>
    %40 = arith.mulf %38, %39 : vector<8x1xf32>
    %41 = arith.subf %28, %40 : vector<8x1xf32>
    %cst_20 = arith.constant 0.899999976 : f32
    %42 = vector.broadcast %cst_20 : f32 to vector<8x32xf32>
    %43 = arith.mulf %42, %22 : vector<8x32xf32>
    %44 = arith.addf %43, %7 : vector<8x32xf32>
    %cst_21 = arith.constant 1.000000e+00 : f32
    %45 = vector.broadcast %cst_21 : f32 to vector<8x32xf32>
    %46 = arith.subf %44, %45 : vector<8x32xf32>
    %cst_22 = arith.constant 1.000000e+01 : f32
    %47 = vector.broadcast %cst_22 : f32 to vector<8x32xf32>
    %48 = arith.mulf %47, %46 : vector<8x32xf32>
    %cst_23 = arith.constant 0.000000e+00 : f32
    %49 = vector.broadcast %cst_23 : f32 to vector<8x32xf32>
    %50 = arith.subf %49, %48 : vector<8x32xf32>
    %51 = math.exp %50 : vector<8x32xf32>
    %cst_24 = arith.constant 1.000000e+00 : f32
    %52 = vector.broadcast %cst_24 : f32 to vector<8x32xf32>
    %53 = arith.addf %52, %51 : vector<8x32xf32>
    %54 = tpu.reciprocal %53 {approx = true} : vector<8x32xf32> -> vector<8x32xf32>
    %55 = vector.broadcast %8 : vector<1x32xf32> to vector<8x32xf32>
    %56 = arith.mulf %54, %55 : vector<8x32xf32>
    %cst_25 = arith.constant dense<0.000000e+00> : vector<8xf32>
    %57 = vector.multi_reduction <add>, %56, %cst_25 [1] : vector<8x32xf32> to vector<8xf32>
    %58 = vector.shape_cast %57 : vector<8xf32> to vector<8x1xf32>
    %59 = vector.broadcast %9 : vector<1x1xf32> to vector<8x1xf32>
    %60 = arith.addf %58, %59 : vector<8x1xf32>
    %cst_26 = arith.constant 0.899999976 : f32
    %61 = vector.broadcast %cst_26 : f32 to vector<8x1xf32>
    %62 = arith.mulf %61, %41 : vector<8x1xf32>
    %63 = arith.addf %62, %60 : vector<8x1xf32>
    %cst_27 = arith.constant 1.000000e+00 : f32
    %64 = vector.broadcast %cst_27 : f32 to vector<8x1xf32>
    %65 = arith.subf %63, %64 : vector<8x1xf32>
    %cst_28 = arith.constant 1.000000e+01 : f32
    %66 = vector.broadcast %cst_28 : f32 to vector<8x1xf32>
    %67 = arith.mulf %66, %65 : vector<8x1xf32>
    %cst_29 = arith.constant 0.000000e+00 : f32
    %68 = vector.broadcast %cst_29 : f32 to vector<8x1xf32>
    %69 = arith.subf %68, %67 : vector<8x1xf32>
    %70 = math.exp %69 : vector<8x1xf32>
    %cst_30 = arith.constant 1.000000e+00 : f32
    %71 = vector.broadcast %cst_30 : f32 to vector<8x1xf32>
    %72 = arith.addf %71, %70 : vector<8x1xf32>
    %73 = tpu.reciprocal %72 {approx = true} : vector<8x1xf32> -> vector<8x1xf32>
    %74 = arith.addf %38, %73 : vector<8x1xf32>
    %cst_31 = arith.constant 5.000000e-01 : f32
    %75 = vector.broadcast %cst_31 : f32 to vector<8x1xf32>
    %76 = arith.mulf %75, %74 : vector<8x1xf32>
    %cst_32 = arith.constant 0.000000e+00 : f32
    %77 = vector.broadcast %cst_32 : f32 to vector<8x1xf32>
    %78 = arith.subf %77, %76 : vector<8x1xf32>
    %79 = math.exp %78 : vector<8x1xf32>
    %cst_33 = arith.constant 1.000000e+00 : f32
    %80 = vector.broadcast %cst_33 : f32 to vector<8x1xf32>
    %81 = arith.addf %80, %79 : vector<8x1xf32>
    %82 = tpu.reciprocal %81 {approx = true} : vector<8x1xf32> -> vector<8x1xf32>
    %c0_34 = arith.constant 0 : index
    %c0_35 = arith.constant 0 : index
    %83 = vector.load %arg6[%c0_34, %c0_35] : memref<8x1xf32, #tpu.memory_space<vmem>>, vector<8x1xf32>
    tpu.vector_store %arg6[%c0_34, %c0_35], %82 {strides = array<i32>} : memref<8x1xf32, #tpu.memory_space<vmem>>, vector<8x1xf32>,
    return
  }
  func.func @transform_0(%arg0: i32) -> (i32, i32) {
    %c0_i32 = arith.constant 0 : i32
    %c0_i32_0 = arith.constant 0 : i32
    return %arg0, %c0_i32 : i32, i32
  }
  func.func @transform_1(%arg0: i32) -> (i32, i32) {
    %c0_i32 = arith.constant 0 : i32
    %c0_i32_0 = arith.constant 0 : i32
    %c0_i32_1 = arith.constant 0 : i32
    return %c0_i32, %c0_i32_0 : i32, i32
  }
  func.func @transform_2(%arg0: i32) -> (i32, i32) {
    %c0_i32 = arith.constant 0 : i32
    %c0_i32_0 = arith.constant 0 : i32
    %c0_i32_1 = arith.constant 0 : i32
    return %c0_i32, %c0_i32_0 : i32, i32
  }
  func.func @transform_3(%arg0: i32) -> (i32, i32) {
    %c0_i32 = arith.constant 0 : i32
    %c0_i32_0 = arith.constant 0 : i32
    %c0_i32_1 = arith.constant 0 : i32
    return %c0_i32, %c0_i32_0 : i32, i32
  }
  func.func @transform_4(%arg0: i32) -> (i32, i32) {
    %c0_i32 = arith.constant 0 : i32
    %c0_i32_0 = arith.constant 0 : i32
    %c0_i32_1 = arith.constant 0 : i32
    return %c0_i32, %c0_i32_0 : i32, i32
  }
  func.func @transform_5(%arg0: i32) -> (i32, i32) {
    %c0_i32 = arith.constant 0 : i32
    %c0_i32_0 = arith.constant 0 : i32
    return %arg0, %c0_i32 : i32, i32
  }
}

</mosaic_0001>

<bundles_post_ra>
// kernel: tpu_custom_call.1
= control target key start
LH: loop header
LB: loop body
LE: loop exit
PB: predicated region body
PF: predicated region fallthrough
CT: control target
= control target key end

     0   :  { %s297_s0 = inlined_call_operand.hbm [shape: f32[8,32], index: 0, kind: input, shape index: {}]   ;;  %s298_s1 = inlined_call_operand.hbm [shape: f32[32,64], index: 1, kind: input, shape index: {}]   ;;  %s299_s2 = inlined_call_operand.vmem [shape: f32[1,64], index: 2, kind: input, shape index: {}]   ;;  %s300_s3 = inlined_call_operand.vmem [shape: f32[1,32], index: 3, kind: input, shape index: {}]   ;;  %s301_s4 = inlined_call_operand.<no memory space> [shape: f32[1,1], index: 4, kind: input, shape index: {}]   ;;  %s302_s5 = inlined_call_operand.vmem [shape: f32[8,1], index: 5, kind: output, shape index: {}]  }
   0x1   :  { %v10_v0 = vstv %s301_s4 }
   0x2   :  { %11 = vst [vmem:[#allocation2] sm:$0x1] %v10_v0 }
   0x3   :  { %12 = vsyncpa [#allocation4], 0  ;;  %s19_s22 = sshll.u32 %s297_s0, 4  ;;  %s20_s22 = int_to_ptr.hbm [resolvable:$true] %s19_s22 }
   0x4   :  { %13 = vsyncpa [#allocation6], 0  ;;  %s241_s23 = smov [#allocation3]   ;;  %s29_s27 = sshll.u32 %s298_s1, 4  ;;  %s30_s27 = int_to_ptr.hbm [resolvable:$true] %s29_s27 }
   0x5   :  { %s21_s24 = sshll.u32 %s241_s23, 4  ;;  %s242_s28 = smov [#allocation5]   ;;  %s22_s24 = int_to_ptr.vmem [resolvable:$true] %s21_s24 }
   0x6   :  { %24 = dma.hbm_to_vmem [thread:$0]  %s20_s22, 128, %s22_s24, [#allocation4]  }
   0x7   :  { %s31_s29 = sshll.u32 %s242_s28, 4  ;;  %s243_s4 = smov 128   ;;  %s32_s29 = int_to_ptr.vmem [resolvable:$true] %s31_s29 }
   0x8   :  { %s244_s30 = smov 8  }
   0x9   :  { %37 = dma.hbm_to_vmem [thread:$0]  %s30_s27, 512, %s32_s29, [#allocation6], %s243_s4, %s243_s4, %s244_s30  }
   0xa   :  { %237 = dma.done.wait [#allocation4], 128  }
   0xb   :  { %238 = vsyncadd [#allocation4], 4294967168 }
   0xc   :  { %239 = dma.done.wait [#allocation6], 512  }
   0xd   :  { %240 = vsyncadd [#allocation6], 4294966784  ;;  %v56_v1 = vld [vmem:[#allocation5 + $0x18] sm:$0xff]  ;;  %v55_v2 = vld [vmem:[#allocation5 + $0x10] sm:$0xff]  ;;  %vm61_vm0 = vcmask 261120   ;;  %s245_s6 = smov 96  }
   0xe   :  { %77 = vmatpush.msra.mxu0 %v56_v1  ;;  %v54_v3 = vld [vmem:[#allocation5 + $0x8] sm:$0xff]  ;;  %v53_v4 = vld [vmem:[#allocation5] sm:$0xff]  ;;  %v52_v5 = vld [vmem:[#allocation3] sm:$0xff]  ;;  %vm148_vm1 = vcmask 7168  }
   0xf   :  { %v166_v6 = vld [vmem:[%s299_s2] ss:$0 sm:$0xff] }
  0x10   :  { %78 = vmatpush.msra.mxu0 %v55_v2  ;;  %v167_v17 = vld [vmem:[%s300_s3] ss:$0 sm:$0xff] }
  0x11   :  { %v168_v32 = vld [vmem:[#allocation2] ss:$0 sm:$0xff] }
  0x12   :  { %79 = vmatpush.msra.mxu0 %v54_v3 }
  0x14   :  { %80 = vmatpush.msra.mxu0 %v53_v4 }
  0x15   :  { %156 = vmatmul.msk.f32.vlgmr.msra.gmra.mxu0 %vm61_vm0, %v52_v5 }
  0x92   :  { %v82_v7 = vpop.f32.mrf.mxu0 }
  0x93   :  { %v83_v8 = vadd.f32 %v166_v6, %v82_v7 }
  0x95   :  { %v157_v9 = vadd.f32 -1.0, %v83_v8  ;;  %116 = vrot.lane.b32.xlu0 %v83_v8, %s245_s6 }
  0x97   :  { %v88_v10 = vmul.f32 10.0, %v157_v9 }
  0x99   :  { %v89_v11 = vsub.f32 0.0, %v88_v10 }
  0x9b   :  { %v90_v12 = vmul.f32 1.442695, %v89_v11 }
  0x9d   :  { %169 = vpow2.f32 %v90_v12 }
  0xa3   :  { %v170_v13 = vpop.eup %169 }
  0xa4   :  { %v92_v14 = vadd.f32 1.0, %v170_v13 }
  0xa6   :  { %171 = vrcp.f32 %v92_v14 }
  0xac   :  { %v172_v15 = vpop.eup %171 }
  0xad   :  { %v94_v16 = vsub.f32 %v83_v8, %v172_v15  ;;  %v98_v18 = vmul.f32 %v172_v15, %v167_v17 }
  0xaf   :  { %v99_v19 = vsel %vm61_vm0, %v98_v18, 0.0  ;;  %v114_v20 = vmul.f32 0.9, %v94_v16 }
  0xbf   :  { %100 = vadd.xlane.f32.xlu0 %v99_v19 }
 0x107   :  { %v117_v21 = vpop.permute.xlu0 %116 }
 0x108   :  { %v119_v22 = vadd.f32 %v117_v21, %v114_v20 }
 0x10a   :  { %v159_v23 = vadd.f32 -1.0, %v119_v22 }
 0x10c   :  { %v121_v24 = vmul.f32 10.0, %v159_v23 }
 0x10e   :  { %v122_v25 = vsub.f32 0.0, %v121_v24 }
 0x110   :  { %v123_v26 = vmul.f32 1.442695, %v122_v25 }
 0x112   :  { %173 = vpow2.f32 %v123_v26 }
 0x118   :  { %v174_v27 = vpop.eup %173 }
 0x119   :  { %v125_v28 = vadd.f32 1.0, %v174_v27 }
 0x11b   :  { %175 = vrcp.f32 %v125_v28 }
 0x121   :  { %v176_v29 = vpop.eup %175 }
 0x122   :  { %v127_v30 = vmul.f32 %v176_v29, %v167_v17 }
 0x124   :  { %v128_v31 = vsel %vm61_vm0, %v127_v30, 0.0 }
 0x125   :  { %129 = vadd.xlane.f32.xlu1 %v128_v31 }
 0x132   :  { %v101_v33 = vpop.xlane.xlu0 %100 }
 0x133   :  { %v105_v34 = vadd.f32 %v168_v32, %v101_v33 }
 0x135   :  { %v158_v35 = vadd.f32 -1.0, %v105_v34 }
 0x137   :  { %v107_v36 = vmul.f32 10.0, %v158_v35 }
 0x139   :  { %v108_v37 = vsub.f32 0.0, %v107_v36 }
 0x13b   :  { %v109_v38 = vmul.f32 1.442695, %v108_v37 }
 0x13d   :  { %177 = vpow2.f32 %v109_v38 }
 0x143   :  { %v178_v39 = vpop.eup %177 }
 0x144   :  { %v111_v40 = vadd.f32 1.0, %v178_v39 }
 0x146   :  { %179 = vrcp.f32 %v111_v40 }
 0x14c   :  { %v180_v41 = vpop.eup %179 }
 0x14d   :  { %v113_v42 = vsub.f32 %v105_v34, %v180_v41 }
 0x14f   :  { %v132_v44 = vmul.f32 0.9, %v113_v42 }
 0x198   :  { %v130_v43 = vpop.xlane.xlu1 %129 }
 0x199   :  { %v131_v45 = vadd.f32 %v168_v32, %v130_v43 }
 0x19b   :  { %v133_v46 = vadd.f32 %v132_v44, %v131_v45 }
 0x19d   :  { %v160_v47 = vadd.f32 -1.0, %v133_v46 }
 0x19f   :  { %v135_v48 = vmul.f32 10.0, %v160_v47 }
 0x1a1   :  { %v136_v49 = vsub.f32 0.0, %v135_v48 }
 0x1a3   :  { %v137_v50 = vmul.f32 1.442695, %v136_v49 }
 0x1a5   :  { %181 = vpow2.f32 %v137_v50 }
 0x1ab   :  { %v182_v51 = vpop.eup %181 }
 0x1ac   :  { %v139_v52 = vadd.f32 1.0, %v182_v51 }
 0x1ae   :  { %183 = vrcp.f32 %v139_v52 }
 0x1b4   :  { %v184_v53 = vpop.eup %183 }
 0x1b5   :  { %v141_v54 = vadd.f32 %v184_v53, %v180_v41 }
 0x1b7   :  { %v142_v55 = vmul.f32 0.5, %v141_v54 }
 0x1b9   :  { %v143_v56 = vsub.f32 0.0, %v142_v55 }
 0x1bb   :  { %v144_v57 = vmul.f32 1.442695, %v143_v56 }
 0x1bd   :  { %185 = vpow2.f32 %v144_v57 }
 0x1c3   :  { %v186_v58 = vpop.eup %185 }
 0x1c4   :  { %v146_v59 = vadd.f32 1.0, %v186_v58 }
 0x1c6   :  { %187 = vrcp.f32 %v146_v59 }
 0x1cc   :  { %v188_v60 = vpop.eup %187 }
 0x1cd   :  { %149 = vst.msk [vmem:[%s302_s5] sm:$0xff] %vm148_vm1, %v188_v60 }
 0x1ce   :  { %154 = vsyncpa [#allocation4], 1 }
 0x1cf   :  { %155 = vsyncpa [#allocation6], 1 }

</bundles_post_ra>
